<compile_context>
chip_gen: v7x
topology: tpu7x:2x2x1
jax: 0.10.0
libtpu: 0.0.40
codegen_flags: <defaults>
</compile_context>

<pallas_src>
import math

import jax
import jax.numpy as jnp
from jax import lax
from jax.experimental import pallas as pl
from jax.experimental.pallas import tpu as pltpu

_EPS = 1e-5


def _cond_feature_mixing_kernel(
    x_ref,      # (tb*L, C_in)      compute dtype (bf16)
    cb_ref,     # (tb, 1, C_out)    f32   per-batch bias: v@Wpv + bp + b2
    av_ref,     # (tb, 1, ff)       bf16  per-batch bias: v@W1v + b1
    wcat_ref,   # (C_in, ff+C_out)  bf16  fused [W1x | Wpx]
    w2_ref,     # (ff, C_out)       bf16  fc2 weight
    gamma_ref,  # (L, C_out)        f32   LayerNorm affine
    beta_ref,   # (L, C_out)        f32
    out_ref,    # (tb, L, C_out)    out dtype (bf16)
):
    tb, L, c_out = out_ref.shape
    ff = av_ref.shape[-1]
    rows = tb * L

    # One fused K=C_in matmul (fc1 half in cols [0:ff], projection half in [ff:]).
    r = jnp.dot(x_ref[...], wcat_ref[...], preferred_element_type=jnp.float32)

    # fc1 + ReLU on concat([x, v]); the static half (v @ W1v + b1) is the precomputed av.
    a = jnp.maximum(
        r[:, :ff].reshape(tb, L, ff) + av_ref[...].astype(jnp.float32), 0.0)
    # TODO(synk): dropout is identity in eval/inference mode, so it is omitted.

    # fc2; projection output is r[:, ff:]; the per-batch bias (v@Wpv + bp + b2) is cbias.
    o = jnp.dot(a.reshape(rows, ff).astype(w2_ref.dtype), w2_ref[...],
                preferred_element_type=jnp.float32)
    y = (r[:, ff:] + o).reshape(tb, L, c_out) + cb_ref[...]

    # LayerNorm over (L, C_out) per batch row (normalize_before=False, nn.LayerNorm).
    # Two-pass: mean first, then centered variance (avoids E[y^2]-mu^2 cancellation).
    inv_n = 1.0 / float(L * c_out)
    mu = jnp.sum(jnp.sum(y, axis=2, keepdims=True), axis=1, keepdims=True) * inv_n
    d = y - mu
    var = jnp.sum(jnp.sum(d * d, axis=2, keepdims=True), axis=1, keepdims=True) * inv_n
    yn = d * lax.rsqrt(var + _EPS)
    out_ref[...] = (yn * gamma_ref[...] + beta_ref[...]).astype(out_ref.dtype)


def conditional_feature_mixing(x, x_static, params, *, tb=None,
                               compute_dtype=jnp.bfloat16, out_dtype=None):
    """Forward pass of ConditionalFeatureMixing. Returns (mixed_out, broadcast_static)."""
    B, L, C_in = x.shape
    C_out = params["ws"].shape[1]
    ff_dim = params["w1x"].shape[1]
    f32 = jnp.float32
    if out_dtype is None:
        out_dtype = compute_dtype

    # ---- static-feature path hoisted out of the kernel (one XLA matmul over all B) ----
    v = x_static.astype(f32) @ params["ws"].astype(f32) + params["bs"].astype(f32)   # (B, C_out)
    # concat([x, v]) @ W == x @ W_x + v @ W_v  -> precompute the v halves per batch row.
    cbias = v @ params["wpv"].astype(f32) + params["bp"] + params["b2"]   # proj bias + fc2 bias
    av = v @ params["w1v"].astype(f32) + params["b1"]                     # fc1 bias

    # Fused K=C_in weight: one MXU matmul produces [fc1 pre-act | projection].
    w_cat = jnp.concatenate(
        [params["w1x"], params["wpx"]], axis=1).astype(compute_dtype)     # (C_in, ff+C_out)
    w2 = params["w2"].astype(compute_dtype)                               # (ff, C_out)
    gamma = params["gamma"].astype(f32)                                   # (L, C_out)
    beta = params["beta"].astype(f32)

    # ---- hardware info / per-generation budgets ----
    try:
        vmem_cap = int(pltpu.get_tpu_info().vmem_capacity_bytes)
    except Exception:
        vmem_cap = 64 << 20                       # conservative (v7x) fallback
    try:
        kind = jax.devices()[0].device_kind.lower()
    except Exception:
        kind = ""
    two_tc = ("v7" in kind) or ("7x" in kind)     # only v7x has 2 TensorCores

    cdt_size = jnp.dtype(compute_dtype).itemsize
    out_size = jnp.dtype(out_dtype).itemsize

    def _rnd(n, m):
        return ((n + m - 1) // m) * m

    def _tile_bytes(t):
        # Padded VMEM layouts: sublanes to 8, lanes to 128. I/O tiles double-buffered.
        rows = t * L
        x_t = _rnd(rows, 8) * _rnd(C_in, 128) * cdt_size
        cb_t = t * 8 * _rnd(C_out, 128) * 4
        av_t = t * 8 * _rnd(ff_dim, 128) * cdt_size
        out_t = t * _rnd(L, 8) * _rnd(C_out, 128) * out_size
        io = 2 * (x_t + cb_t + av_t + out_t)
        interm = _rnd(rows, 8) * (_rnd(ff_dim + C_out, 128) + _rnd(ff_dim, 128)
                                  + 3 * _rnd(C_out, 128)) * 4
        wts = (_rnd(C_in, 8) * _rnd(ff_dim + C_out, 128)
               + _rnd(ff_dim, 8) * _rnd(C_out, 128)) * cdt_size \
              + 2 * _rnd(L, 8) * _rnd(C_out, 128) * 4
        return io + interm + wts

    # ---- batch tiling: tb rows per grid step so the matmul M dim is tb*L (~1024) ----
    # Block rows (tb*L) must stay a multiple of 8 for the 2-D x block.
    row_align = 8 // math.gcd(L, 8)
    if tb is None:
        tb = (max(1, 1024 // max(L, 1)) // row_align) * row_align
        tb = max(row_align, min(tb, _rnd(B, row_align)))
    else:
        tb = max(row_align, (tb // row_align) * row_align)

    # Stay within a per-generation VMEM tile budget (v5e/v6e: 128 MiB phys; v7x: 64 MiB).
    tile_budget = min(vmem_cap // 2, 64 << 20)
    while tb > row_align and _tile_bytes(tb) > tile_budget:
        tb = max(row_align, ((tb // 2) // row_align) * row_align)

    # Only on dual-TensorCore chips (v7x): keep >= 2 grid steps so both cores get work.
    if two_tc:
        while tb > row_align and pl.cdiv(B, tb) < 2:
            tb = max(row_align, ((tb // 2) // row_align) * row_align)

    Bp = pl.cdiv(B, tb) * tb
    xk = x.astype(compute_dtype)
    if Bp != B:  # zero-pad the batch; padded rows never leak (LN is per row) and are sliced off
        xk = jnp.pad(xk, ((0, Bp - B), (0, 0), (0, 0)))
        cbias = jnp.pad(cbias, ((0, Bp - B), (0, 0)))
        av = jnp.pad(av, ((0, Bp - B), (0, 0)))
    xk = xk.reshape(Bp * L, C_in)                               # wrapper-side reshape (free)
    cbias = cbias.astype(f32).reshape(Bp, 1, C_out)
    avk = av.astype(compute_dtype).reshape(Bp, 1, ff_dim)

    weights = [w_cat, w2, gamma, beta]

    def full_spec(a):
        nd = a.ndim
        return pl.BlockSpec(a.shape, lambda b, nd=nd: (0,) * nd)

    in_specs = [
        pl.BlockSpec((tb * L, C_in), lambda b: (b, 0)),         # dynamic features (2-D rows)
        pl.BlockSpec((tb, 1, C_out), lambda b: (b, 0, 0)),      # folded proj/fc2 bias
        pl.BlockSpec((tb, 1, ff_dim), lambda b: (b, 0, 0)),     # folded fc1 bias
    ] + [full_spec(w) for w in weights]

    out_spec = pl.BlockSpec((tb, L, C_out), lambda b: (b, 0, 0))

    vmem_limit = int(min(max(vmem_cap - (8 << 20), 16 << 20),
                         max(32 << 20, _tile_bytes(tb) + (16 << 20))))

    out = pl.pallas_call(
        _cond_feature_mixing_kernel,
        out_shape=jax.ShapeDtypeStruct((Bp, L, C_out), out_dtype),
        grid=(Bp // tb,),
        in_specs=in_specs,
        out_specs=out_spec,
        compiler_params=pltpu.CompilerParams(
            dimension_semantics=("parallel",),
            vmem_limit_bytes=vmem_limit),
    )(xk, cbias, avk, *weights)

    out = out[:B]
    vb = jnp.broadcast_to(v[:, None, :], (B, L, C_out))  # broadcast static features (outside kernel)
    return out, vb


def _reference(x, x_static, p):
    """Pure-JAX f32 reference mirroring the PyTorch forward (eval mode)."""
    v = x_static @ p["ws"] + p["bs"]                                   # (B, C_out)
    vb = jnp.broadcast_to(v[:, None, :], (x.shape[0], x.shape[1], v.shape[-1]))
    h = jnp.concatenate([x, vb], axis=-1)
    x_proj = h @ jnp.concatenate([p["wpx"], p["wpv"]], axis=0) + p["bp"]
    a = jax.nn.relu(h @ jnp.concatenate([p["w1x"], p["w1v"]], axis=0) + p["b1"])
    o = a @ p["w2"] + p["b2"]
    y = x_proj + o
    mu = jnp.mean(y, axis=(1, 2), keepdims=True)
    var = jnp.mean((y - mu) ** 2, axis=(1, 2), keepdims=True)
    yn = (y - mu) / jnp.sqrt(var + _EPS)
    return yn * p["gamma"] + p["beta"], vb


if __name__ == "__main__":
    # Small shapes consistent with the module.
    B, L = 8, 8            # batch, sequence_length (time steps)
    C_in = 4               # input_channels (dynamic)
    C_out = 6              # output_channels
    C_static = 3           # static_channels
    ff_dim = 32            # feed-forward dim

    key = jax.random.PRNGKey(0)
    ks = jax.random.split(key, 16)

    def init(k, shape, scale=0.1):
        return (scale * jax.random.normal(k, shape)).astype(jnp.float32)

    params = {
        # fr_static: Linear(static_channels, output_channels); stored transposed for x @ W.
        "ws":  init(ks[0], (C_static, C_out)),
        "bs":  init(ks[1], (1, C_out)),
        # projection: Linear(C_in + C_out, C_out), split into dynamic/static halves.
        "wpx": init(ks[2], (C_in, C_out)),
        "wpv": init(ks[3], (C_out, C_out)),
        "bp":  init(ks[4], (1, C_out)),
        # fc1: Linear(C_in + C_out, ff_dim), split.
        "w1x": init(ks[5], (C_in, ff_dim)),
        "w1v": init(ks[6], (C_out, ff_dim)),
        "b1":  init(ks[7], (1, ff_dim)),
        # fc2: Linear(ff_dim, C_out).
        "w2":  init(ks[8], (ff_dim, C_out)),
        "b2":  init(ks[9], (1, C_out)),
        # LayerNorm((L, C_out)) affine params.
        "gamma": jnp.ones((L, C_out), jnp.float32) + init(ks[10], (L, C_out), 0.05),
        "beta":  init(ks[11], (L, C_out), 0.05),
    }

    x = jax.random.normal(ks[12], (B, L, C_in), dtype=jnp.float32)
    x_static = jax.random.normal(ks[13], (B, C_static), dtype=jnp.float32)

    out, v_out = conditional_feature_mixing(x, x_static, params)
    out = jax.block_until_ready(out)
    v_out = jax.block_until_ready(v_out)

    ref_out, ref_v = _reference(x, x_static, params)
    # bf16 matmul operands + bf16 output store (f32 accumulation / f32 LayerNorm) ->
    # ~1e-2 level tolerance on the mixed output.
    assert jnp.allclose(out.astype(jnp.float32), ref_out, atol=3e-2, rtol=3e-2), \
        "mixed output mismatch"
    assert jnp.allclose(v_out, ref_v, atol=1e-5, rtol=1e-5), "static features mismatch"
    assert out.shape == (B, L, C_out) and v_out.shape == (B, L, C_out)

    print("KERNEL_OK")
</pallas_src>

<mosaic_0001>
module attributes {stable_mosaic.version = 11 : i64} {
  func.func @_cond_feature_mixing_kernel(%arg0: i32, %arg1: memref<64x4xbf16, #tpu.memory_space<vmem>>, %arg2: memref<8x1x6xf32, #tpu.memory_space<vmem>>, %arg3: memref<8x1x32xbf16, #tpu.memory_space<vmem>>, %arg4: memref<4x38xbf16, #tpu.memory_space<vmem>>, %arg5: memref<32x6xbf16, #tpu.memory_space<vmem>>, %arg6: memref<8x6xf32, #tpu.memory_space<vmem>>, %arg7: memref<8x6xf32, #tpu.memory_space<vmem>>, %arg8: memref<8x8x6xbf16, #tpu.memory_space<vmem>>) attributes {dimension_semantics = [#tpu.dimension_semantics<parallel>], iteration_bounds = array<i64: 1>, scalar_prefetch = 0 : i64, scratch_operands = 0 : i64, tpu.core_type = #tpu.core_type<tc>, window_params = [{transform_indices = @transform_0, window_bounds = array<i64: 64, 4>}, {transform_indices = @transform_1, window_bounds = array<i64: 8, 1, 6>}, {transform_indices = @transform_2, window_bounds = array<i64: 8, 1, 32>}, {pipeline_mode = #tpu.pipeline_mode<synchronous>, transform_indices = @transform_3, window_bounds = array<i64: 4, 38>}, {pipeline_mode = #tpu.pipeline_mode<synchronous>, transform_indices = @transform_4, window_bounds = array<i64: 32, 6>}, {pipeline_mode = #tpu.pipeline_mode<synchronous>, transform_indices = @transform_5, window_bounds = array<i64: 8, 6>}, {pipeline_mode = #tpu.pipeline_mode<synchronous>, transform_indices = @transform_6, window_bounds = array<i64: 8, 6>}, {transform_indices = @transform_7, window_bounds = array<i64: 8, 8, 6>}]} {
    %c0 = arith.constant 0 : index
    %c0_0 = arith.constant 0 : index
    %0 = vector.load %arg1[%c0, %c0_0] : memref<64x4xbf16, #tpu.memory_space<vmem>>, vector<64x4xbf16>
    %c0_1 = arith.constant 0 : index
    %c0_2 = arith.constant 0 : index
    %1 = vector.load %arg4[%c0_1, %c0_2] : memref<4x38xbf16, #tpu.memory_space<vmem>>, vector<4x38xbf16>
    %cst = arith.constant dense<0.000000e+00> : vector<64x38xf32>
    %2 = tpu.matmul %0, %1, %cst {dimension_numbers = #tpu.dot_dimension_numbers<[1], [0], [0], [1], [0, 0, 1, 1], [], []>} : vector<64x4xbf16>, vector<4x38xbf16>, vector<64x38xf32> -> vector<64x38xf32>
    %3 = vector.extract_strided_slice %2 {offsets = [0, 0], sizes = [64, 32], strides = [1, 1]} : vector<64x38xf32> to vector<64x32xf32>
    %4 = vector.shape_cast %3 : vector<64x32xf32> to vector<8x8x32xf32>
    %c0_3 = arith.constant 0 : index
    %c0_4 = arith.constant 0 : index
    %c0_5 = arith.constant 0 : index
    %5 = vector.load %arg3[%c0_3, %c0_4, %c0_5] : memref<8x1x32xbf16, #tpu.memory_space<vmem>>, vector<8x1x32xbf16>
    %6 = arith.extf %5 : vector<8x1x32xbf16> to vector<8x1x32xf32>
    %7 = vector.broadcast %6 : vector<8x1x32xf32> to vector<8x8x32xf32>
    %8 = arith.addf %4, %7 : vector<8x8x32xf32>
    %cst_6 = arith.constant 0.000000e+00 : f32
    %9 = vector.broadcast %cst_6 : f32 to vector<8x8x32xf32>
    %10 = arith.maximumf %8, %9 : vector<8x8x32xf32>
    %11 = vector.shape_cast %10 : vector<8x8x32xf32> to vector<64x32xf32>
    %12 = arith.truncf %11 : vector<64x32xf32> to vector<64x32xbf16>
    %c0_7 = arith.constant 0 : index
    %c0_8 = arith.constant 0 : index
    %13 = vector.load %arg5[%c0_7, %c0_8] : memref<32x6xbf16, #tpu.memory_space<vmem>>, vector<32x6xbf16>
    %cst_9 = arith.constant dense<0.000000e+00> : vector<64x6xf32>
    %14 = tpu.matmul %12, %13, %cst_9 {dimension_numbers = #tpu.dot_dimension_numbers<[1], [0], [0], [1], [0, 0, 1, 1], [], []>} : vector<64x32xbf16>, vector<32x6xbf16>, vector<64x6xf32> -> vector<64x6xf32>
    %15 = vector.extract_strided_slice %2 {offsets = [0, 32], sizes = [64, 6], strides = [1, 1]} : vector<64x38xf32> to vector<64x6xf32>
    %16 = arith.addf %15, %14 : vector<64x6xf32>
    %17 = vector.shape_cast %16 : vector<64x6xf32> to vector<8x8x6xf32>
    %c0_10 = arith.constant 0 : index
    %c0_11 = arith.constant 0 : index
    %c0_12 = arith.constant 0 : index
    %18 = vector.load %arg2[%c0_10, %c0_11, %c0_12] : memref<8x1x6xf32, #tpu.memory_space<vmem>>, vector<8x1x6xf32>
    %19 = vector.broadcast %18 : vector<8x1x6xf32> to vector<8x8x6xf32>
    %20 = arith.addf %17, %19 : vector<8x8x6xf32>
    %cst_13 = arith.constant dense<0.000000e+00> : vector<8x8xf32>
    %21 = vector.multi_reduction <add>, %20, %cst_13 [2] : vector<8x8x6xf32> to vector<8x8xf32>
    %22 = vector.shape_cast %21 : vector<8x8xf32> to vector<8x8x1xf32>
    %cst_14 = arith.constant dense<0.000000e+00> : vector<8x1xf32>
    %23 = vector.multi_reduction <add>, %22, %cst_14 [1] : vector<8x8x1xf32> to vector<8x1xf32>
    %24 = vector.shape_cast %23 : vector<8x1xf32> to vector<8x1x1xf32>
    %cst_15 = arith.constant 0.020833334 : f32
    %25 = vector.broadcast %cst_15 : f32 to vector<8x1x1xf32>
    %26 = arith.mulf %24, %25 : vector<8x1x1xf32>
    %27 = vector.broadcast %26 : vector<8x1x1xf32> to vector<8x8x6xf32>
    %28 = arith.subf %20, %27 : vector<8x8x6xf32>
    %29 = arith.mulf %28, %28 : vector<8x8x6xf32>
    %cst_16 = arith.constant dense<0.000000e+00> : vector<8x8xf32>
    %30 = vector.multi_reduction <add>, %29, %cst_16 [2] : vector<8x8x6xf32> to vector<8x8xf32>
    %31 = vector.shape_cast %30 : vector<8x8xf32> to vector<8x8x1xf32>
    %cst_17 = arith.constant dense<0.000000e+00> : vector<8x1xf32>
    %32 = vector.multi_reduction <add>, %31, %cst_17 [1] : vector<8x8x1xf32> to vector<8x1xf32>
    %33 = vector.shape_cast %32 : vector<8x1xf32> to vector<8x1x1xf32>
    %cst_18 = arith.constant 0.020833334 : f32
    %34 = vector.broadcast %cst_18 : f32 to vector<8x1x1xf32>
    %35 = arith.mulf %33, %34 : vector<8x1x1xf32>
    %cst_19 = arith.constant 9.99999974E-6 : f32
    %36 = vector.broadcast %cst_19 : f32 to vector<8x1x1xf32>
    %37 = arith.addf %35, %36 : vector<8x1x1xf32>
    %38 = math.rsqrt %37 : vector<8x1x1xf32>
    %39 = vector.broadcast %38 : vector<8x1x1xf32> to vector<8x8x6xf32>
    %40 = arith.mulf %28, %39 : vector<8x8x6xf32>
    %c0_20 = arith.constant 0 : index
    %c0_21 = arith.constant 0 : index
    %41 = vector.load %arg6[%c0_20, %c0_21] : memref<8x6xf32, #tpu.memory_space<vmem>>, vector<8x6xf32>
    %42 = vector.shape_cast %41 : vector<8x6xf32> to vector<1x8x6xf32>
    %43 = vector.broadcast %42 : vector<1x8x6xf32> to vector<8x8x6xf32>
    %44 = arith.mulf %40, %43 : vector<8x8x6xf32>
    %c0_22 = arith.constant 0 : index
    %c0_23 = arith.constant 0 : index
    %45 = vector.load %arg7[%c0_22, %c0_23] : memref<8x6xf32, #tpu.memory_space<vmem>>, vector<8x6xf32>
    %46 = vector.shape_cast %45 : vector<8x6xf32> to vector<1x8x6xf32>
    %47 = vector.broadcast %46 : vector<1x8x6xf32> to vector<8x8x6xf32>
    %48 = arith.addf %44, %47 : vector<8x8x6xf32>
    %49 = arith.truncf %48 : vector<8x8x6xf32> to vector<8x8x6xbf16>
    %c0_24 = arith.constant 0 : index
    %c0_25 = arith.constant 0 : index
    %c0_26 = arith.constant 0 : index
    %50 = vector.load %arg8[%c0_24, %c0_25, %c0_26] : memref<8x8x6xbf16, #tpu.memory_space<vmem>>, vector<8x8x6xbf16>
    tpu.vector_store %arg8[%c0_24, %c0_25, %c0_26], %49 {strides = array<i32>} : memref<8x8x6xbf16, #tpu.memory_space<vmem>>, vector<8x8x6xbf16>,
    return
  }
  func.func @transform_0(%arg0: i32) -> (i32, i32) {
    %c0_i32 = arith.constant 0 : i32
    %c0_i32_0 = arith.constant 0 : i32
    return %arg0, %c0_i32 : i32, i32
  }
  func.func @transform_1(%arg0: i32) -> (i32, i32, i32) {
    %c0_i32 = arith.constant 0 : i32
    %c0_i32_0 = arith.constant 0 : i32
    %c0_i32_1 = arith.constant 0 : i32
    return %arg0, %c0_i32, %c0_i32_0 : i32, i32, i32
  }
  func.func @transform_2(%arg0: i32) -> (i32, i32, i32) {
    %c0_i32 = arith.constant 0 : i32
    %c0_i32_0 = arith.constant 0 : i32
    %c0_i32_1 = arith.constant 0 : i32
    return %arg0, %c0_i32, %c0_i32_0 : i32, i32, i32
  }
  func.func @transform_3(%arg0: i32) -> (i32, i32) {
    %c0_i32 = arith.constant 0 : i32
    %c0_i32_0 = arith.constant 0 : i32
    %c0_i32_1 = arith.constant 0 : i32
    return %c0_i32, %c0_i32_0 : i32, i32
  }
  func.func @transform_4(%arg0: i32) -> (i32, i32) {
    %c0_i32 = arith.constant 0 : i32
    %c0_i32_0 = arith.constant 0 : i32
    %c0_i32_1 = arith.constant 0 : i32
    return %c0_i32, %c0_i32_0 : i32, i32
  }
  func.func @transform_5(%arg0: i32) -> (i32, i32) {
    %c0_i32 = arith.constant 0 : i32
    %c0_i32_0 = arith.constant 0 : i32
    %c0_i32_1 = arith.constant 0 : i32
    return %c0_i32, %c0_i32_0 : i32, i32
  }
  func.func @transform_6(%arg0: i32) -> (i32, i32) {
    %c0_i32 = arith.constant 0 : i32
    %c0_i32_0 = arith.constant 0 : i32
    %c0_i32_1 = arith.constant 0 : i32
    return %c0_i32, %c0_i32_0 : i32, i32
  }
  func.func @transform_7(%arg0: i32) -> (i32, i32, i32) {
    %c0_i32 = arith.constant 0 : i32
    %c0_i32_0 = arith.constant 0 : i32
    %c0_i32_1 = arith.constant 0 : i32
    return %arg0, %c0_i32, %c0_i32_0 : i32, i32, i32
  }
}

</mosaic_0001>

<bundles_post_ra>
// kernel: tpu_custom_call.1
= control target key start
LH: loop header
LB: loop body
LE: loop exit
PB: predicated region body
PF: predicated region fallthrough
CT: control target
= control target key end

     0   :  { %vm69_vm0 = vcmask 1041408   ;;  %vm56_vm1 = vcmask 31744   ;;  %v154_v14 = vlaneseq  ;;  %vm222_vm2 = vcmask 261120   ;;  %s1183_s3 = inlined_call_operand.vmem [shape: bf16[4,38], index: 3, kind: input, shape index: {}]   ;;  %s1184_s0 = inlined_call_operand.vmem [shape: bf16[64,4], index: 0, kind: input, shape index: {}]   ;;  %s1185_s4 = inlined_call_operand.vmem [shape: bf16[32,6], index: 4, kind: input, shape index: {}]   ;;  %s1186_s1 = inlined_call_operand.vmem [shape: f32[8,1,6], index: 1, kind: input, shape index: {}]   ;;  %s1187_s2 = inlined_call_operand.vmem [shape: bf16[8,1,32], index: 2, kind: input, shape index: {}]   ;;  %s1188_s5 = inlined_call_operand.vmem [shape: f32[8,6], index: 5, kind: input, shape index: {}]   ;;  %s1189_s6 = inlined_call_operand.vmem [shape: f32[8,6], index: 6, kind: input, shape index: {}]   ;;  %s1190_s7 = inlined_call_operand.vmem [shape: bf16[8,8,6], index: 7, kind: output, shape index: {}]  }
   0x1   :  { %v35_v0 = vld [vmem:[%s1183_s3] sm:$0x3]  ;;  %v855_v3 = vld [vmem:[%s1184_s0 + $0x8] sm:$0xff]   ;;  %v856_v4 = vld [vmem:[%s1184_s0 + $0x10] sm:$0xff]   ;;  %vm452_vm3 = vcmask 48128   ;;  %vm767_vm4 = vcmask 44032  }
   0x2   :  { %851 = vmatprep.subr.msk.bf16.mxu0 %vm69_vm0, %v35_v0  ;;  %v71_v1 = vsel %vm69_vm0, %v35_v0, 0  ;;  %v854_v2 = vld [vmem:[%s1184_s0] sm:$0xff]   ;;  %v857_v5 = vld [vmem:[%s1184_s0 + $0x18] sm:$0xff]   ;;  %v859_v7 = vld [vmem:[%s1185_s4 + $0x8] sm:$0xff]   ;;  %s876_s0 = smov 32   ;;  %v155_v15 = vshrl.u32 %v154_v14, 7 }
   0x3   :  { %830 = vmatpush3.bf16.msra.mxu0 %v71_v1  ;;  %831 = vmatprep.mubr.msk.bf16.mxu0 %vm56_vm1, %v854_v2  ;;  %v858_v6 = vld [vmem:[%s1185_s4] sm:$0xff]  }
   0x4   :  { %839 = vmatprep.subr.bf16.mxu1 %v858_v6  ;;  %v795_v8 = vld [vmem:[%s1186_s1 + $0x1] ss:$0 sm:$0xff]  ;;  %v794_v9 = vld [vmem:[%s1186_s1] ss:$0 sm:$0xff]  ;;  %v797_v10 = vld [vmem:[%s1186_s1 + $0x3] ss:$0 sm:$0xff] }
   0x5   :  { %840 = vmatpush3.bf16.msra.mxu1 %v858_v6  ;;  %390 = vrot.lane.b32.xlu1 %v795_v8, %s876_s0  ;;  %v796_v11 = vld [vmem:[%s1186_s1 + $0x2] ss:$0 sm:$0xff]  ;;  %v799_v12 = vld [vmem:[%s1186_s1 + $0x5] ss:$0 sm:$0xff]  ;;  %v798_v13 = vld [vmem:[%s1186_s1 + $0x4] ss:$0 sm:$0xff] }
   0x6   :  { %832 = vmatmul.mubr.msk.bf16.vlgmr.msra.gmra.mrb[0].mxu0 %vm56_vm1, %v855_v3  ;;  %841 = vmatprep.subr.bf16.mxu1 %v859_v7  ;;  %v140_v16 = vld [vmem:[%s1187_s2 + $0x2] sm:$0x1]  ;;  %v138_v17 = vld [vmem:[%s1187_s2] sm:$0x1]  ;;  %v141_v18 = vld [vmem:[%s1187_s2 + $0x3] sm:$0x1] }
   0x7   :  { %835 = vmatprep.mubr.msk.bf16.mxu0 %vm56_vm1, %v856_v4  ;;  %388 = vrot.lane.b32.xlu0 %v794_v9, %s876_s0  ;;  %v148_v19 = vunpack.c.l.bf16 %v140_v16  ;;  %v156_v20 = vsub.s32 0, %v155_v15  ;;  %v139_v21 = vld [vmem:[%s1187_s2 + $0x1] sm:$0x1]  ;;  %v146_v22 = vunpack.c.l.bf16 %v138_v17  ;;  %v149_v23 = vunpack.c.l.bf16 %v141_v18  ;;  %v144_v27 = vld [vmem:[%s1187_s2 + $0x6] sm:$0x1] }
   0x8   :  { %v147_v24 = vunpack.c.l.bf16 %v139_v21  ;;  %v142_v29 = vld [vmem:[%s1187_s2 + $0x4] sm:$0x1]  ;;  %v145_v32 = vld [vmem:[%s1187_s2 + $0x7] sm:$0x1]  ;;  %v152_v35 = vunpack.c.l.bf16 %v144_v27  ;;  %v143_v36 = vld [vmem:[%s1187_s2 + $0x5] sm:$0x1] }
   0x9   :  { %842 = vmatpush3.bf16.msra.mxu1 %v859_v7  ;;  %394 = vrot.lane.b32.xlu1 %v797_v10, %s876_s0  ;;  %v165_v25 = vrot.slane %v148_v19, %v156_v20  ;;  %v157_v26 = vrot.slane %v146_v22, %v156_v20  ;;  %v169_v28 = vrot.slane %v149_v23, %v156_v20  ;;  %v150_v39 = vunpack.c.l.bf16 %v142_v29  ;;  %v801_v14 = vld [vmem:[%s1186_s1 + $0x7] ss:$0 sm:$0xff] }
   0xa   :  { %v161_v31 = vrot.slane %v147_v24, %v156_v20  ;;  %v153_v42 = vunpack.c.l.bf16 %v145_v32  ;;  %v151_v44 = vunpack.c.l.bf16 %v143_v36  ;;  %v181_v47 = vrot.slane %v152_v35, %v156_v20 }
   0xb   :  { %392 = vrot.lane.b32.xlu0 %v796_v11, %s876_s0  ;;  %v173_v50 = vrot.slane %v150_v39, %v156_v20 }
   0xc   :  { %v185_v52 = vrot.slane %v153_v42, %v156_v20  ;;  %v177_v55 = vrot.slane %v151_v44, %v156_v20 }
   0xd   :  { %398 = vrot.lane.b32.xlu1 %v799_v12, %s876_s0 }
   0xe   :  { %836 = vmatmul.mubr.msk.bf16.gmra.mrb[4].mxu0 %vm56_vm1, %v857_v5 }
   0xf   :  { %396 = vrot.lane.b32.xlu0 %v798_v13, %s876_s0  ;;  %v800_v13 = vld [vmem:[%s1186_s1 + $0x6] ss:$0 sm:$0xff]  ;;  %s877_s1 = smov 96  }
  0x77   :  { %v391_v15 = vpop.permute.xlu1 %390 }
  0x79   :  { %v389_v16 = vpop.permute.xlu0 %388 }
  0x7b   :  { %v395_v17 = vpop.permute.xlu1 %394 }
  0x7d   :  { %v393_v18 = vpop.permute.xlu0 %392 }
  0x7f   :  { %v399_v19 = vpop.permute.xlu1 %398 }
  0x81   :  { %v397_v20 = vpop.permute.xlu0 %396 }
  0xd9   :  { %v981_v30 = vpop.f32.mrb[0].mxu0 }
  0xda   :  { %v188_v33 = vadd.f32 %v981_v30, %v165_v25  ;;  %v987_v34 = vpop.f32.mrb[1].mxu0 }
  0xdb   :  { %v186_v37 = vadd.f32 %v157_v26, %v987_v34  ;;  %v993_v38 = vpop.f32.mrb[2].mxu0 }
  0xdc   :  { %v189_v40 = vadd.f32 %v993_v38, %v169_v28  ;;  %v996_v41 = vpop.f32.mrb[3].mxu0  ;;  %v196_v45 = vmax.f32 %v188_v33, 0.0 }
  0xdd   :  { %v187_v43 = vadd.f32 %v161_v31, %v996_v41  ;;  %v194_v48 = vmax.f32 %v186_v37, 0.0 }
  0xde   :  { %v197_v46 = vmax.f32 %v189_v40, 0.0 }
  0xdf   :  { %v195_v49 = vmax.f32 %v187_v43, 0.0 }
  0xe0   :  { %v203_v51 = vpack.c.bf16 %v197_v46, %v196_v45 }
  0xe1   :  { %v999_v53 = vpop.f32.mrb[4].mxu0  ;;  %v202_v54 = vpack.c.bf16 %v195_v49, %v194_v48 }
  0xe2   :  { %v192_v56 = vadd.f32 %v999_v53, %v181_v47  ;;  %v123_v57 = vpop.f32.mrb[5].mxu0 }
  0xe3   :  { %v190_v58 = vadd.f32 %v173_v50, %v123_v57  ;;  %v1002_v59 = vpop.f32.mrb[6].mxu0  ;;  %843 = vmatprep.mubr.msk.bf16.mxu1 %vm222_vm2, %v202_v54 }
  0xe4   :  { %v200_v60 = vmax.f32 %v192_v56, 0.0  ;;  %v193_v61 = vadd.f32 %v1002_v59, %v185_v52  ;;  %v126_v62 = vpop.f32.mrb[7].mxu0  ;;  %844 = vmatmul.mubr.msk.bf16.vlgmr.msra.gmra.mrb[0].mxu1 %vm222_vm2, %v203_v51 }
  0xe5   :  { %v198_v63 = vmax.f32 %v190_v58, 0.0  ;;  %v191_v0 = vadd.f32 %v177_v55, %v126_v62 }
  0xe6   :  { %v201_v1 = vmax.f32 %v193_v61, 0.0 }
  0xe7   :  { %v199_v2 = vmax.f32 %v191_v0, 0.0 }
  0xe8   :  { %v205_v3 = vpack.c.bf16 %v201_v1, %v200_v60 }
  0xe9   :  { %v204_v4 = vpack.c.bf16 %v199_v2, %v198_v63 }
  0xeb   :  { %847 = vmatprep.mubr.msk.bf16.mxu1 %vm222_vm2, %v204_v4 }
  0xec   :  { %848 = vmatmul.mubr.msk.bf16.gmra.mrb[4].mxu1 %vm222_vm2, %v205_v3 }
 0x1b7   :  { %v845_v5 = vpop.f32.mrb[0].mxu1 }
 0x1b8   :  { %312 = vrot.lane.b32.xlu1 %v845_v5, %s876_s0  ;;  %v269_v6 = vpop.f32.mrb[1].mxu1 }
 0x1b9   :  { %308 = vrot.lane.b32.xlu0 %v269_v6, %s876_s0  ;;  %v846_v7 = vpop.f32.mrb[2].mxu1 }
 0x1ba   :  { %v272_v8 = vpop.f32.mrb[3].mxu1 }
 0x1bc   :  { %314 = vrot.lane.b32.xlu1 %v846_v7, %s876_s0 }
 0x1bd   :  { %310 = vrot.lane.b32.xlu0 %v272_v8, %s876_s0 }
 0x1bf   :  { %v849_v9 = vpop.f32.mrb[4].mxu1 }
 0x1c0   :  { %v285_v10 = vpop.f32.mrb[5].mxu1 }
 0x1c1   :  { %320 = vrot.lane.b32.xlu0 %v849_v9, %s876_s0  ;;  %v850_v11 = vpop.f32.mrb[6].mxu1 }
 0x1c2   :  { %322 = vrot.lane.b32.xlu1 %v850_v11, %s876_s0  ;;  %v288_v12 = vpop.f32.mrb[7].mxu1 }
 0x1c5   :  { %316 = vrot.lane.b32.xlu0 %v285_v10, %s876_s0 }
 0x1c6   :  { %318 = vrot.lane.b32.xlu1 %v288_v12, %s876_s0 }
 0x1c9   :  { %400 = vrot.lane.b32.xlu0 %v800_v13, %s876_s0 }
 0x1ca   :  { %402 = vrot.lane.b32.xlu1 %v801_v14, %s876_s0 }
 0x22a   :  { %v313_v21 = vpop.permute.xlu1 %312 }
 0x22b   :  { %v334_v22 = vadd.f32 %v981_v30, %v313_v21  ;;  %v309_v23 = vpop.permute.xlu0 %308 }
 0x22c   :  { %v332_v25 = vadd.f32 %v309_v23, %v987_v34 }
 0x22d   :  { %v1026_v24 = vadd.f32 %v393_v18, %v334_v22 }
 0x22e   :  { %v315_v26 = vpop.permute.xlu1 %314  ;;  %v1032_v29 = vadd.f32 %v389_v16, %v332_v25 }
 0x22f   :  { %v335_v27 = vadd.f32 %v993_v38, %v315_v26  ;;  %v311_v28 = vpop.permute.xlu0 %310  ;;  %432 = vrot.lane.b32.xlu0 %v1026_v24, %s877_s1 }
 0x230   :  { %v333_v32 = vadd.f32 %v311_v28, %v996_v41 }
 0x231   :  { %v1034_v31 = vadd.f32 %v395_v17, %v335_v27 }
 0x232   :  { %v1041_v34 = vadd.f32 %v391_v15, %v333_v32 }
 0x233   :  { %v321_v30 = vpop.permute.xlu0 %320  ;;  %428 = vrot.lane.b32.xlu0 %v1032_v29, %s877_s1  ;;  %434 = vrot.lane.b32.xlu1 %v1034_v31, %s877_s1 }
 0x234   :  { %v323_v33 = vpop.permute.xlu1 %322  ;;  %v338_v42 = vadd.f32 %v999_v53, %v321_v30 }
 0x235   :  { %v339_v44 = vadd.f32 %v1002_v59, %v323_v33 }
 0x237   :  { %v317_v35 = vpop.permute.xlu0 %316  ;;  %430 = vrot.lane.b32.xlu1 %v1041_v34, %s877_s1 }
 0x238   :  { %v336_v36 = vadd.f32 %v317_v35, %v123_v57  ;;  %v319_v37 = vpop.permute.xlu1 %318 }
 0x239   :  { %v337_v38 = vadd.f32 %v319_v37, %v126_v62 }
 0x23a   :  { %v1045_v39 = vadd.f32 %v397_v20, %v336_v36 }
 0x23b   :  { %v1047_v40 = vadd.f32 %v399_v19, %v337_v38  ;;  %v401_v41 = vpop.permute.xlu0 %400 }
 0x23c   :  { %436 = vrot.lane.b32.xlu0 %v1045_v39, %s877_s1  ;;  %v403_v43 = vpop.permute.xlu1 %402  ;;  %v1055_v45 = vadd.f32 %v401_v41, %v338_v42 }
 0x23d   :  { %438 = vrot.lane.b32.xlu1 %v1047_v40, %s877_s1  ;;  %v1057_v46 = vadd.f32 %v403_v43, %v339_v44 }
 0x240   :  { %440 = vrot.lane.b32.xlu0 %v1055_v45, %s877_s1 }
 0x241   :  { %442 = vrot.lane.b32.xlu1 %v1057_v46, %s877_s1 }
 0x2a1   :  { %v433_v47 = vpop.permute.xlu0 %432 }
 0x2a2   :  { %v459_v48 = vsel %vm452_vm3, %v433_v47, 0.0 }
 0x2a3   :  { %460 = vadd.xlane.f32.xlu0 %v459_v48 }
 0x2a5   :  { %v429_v49 = vpop.permute.xlu0 %428  ;;  %v435_v50 = vpop.permute.xlu1 %434 }
 0x2a6   :  { %v453_v51 = vsel %vm452_vm3, %v429_v49, 0.0  ;;  %v462_v53 = vsel %vm452_vm3, %v435_v50, 0.0 }
 0x2a7   :  { %454 = vadd.xlane.f32.xlu0 %v453_v51 }
 0x2a9   :  { %v431_v52 = vpop.permute.xlu1 %430 }
 0x2aa   :  { %v456_v54 = vsel %vm452_vm3, %v431_v52, 0.0 }
 0x2ab   :  { %463 = vadd.xlane.f32.xlu0 %v462_v53  ;;  %457 = vadd.xlane.f32.xlu1 %v456_v54 }
 0x2ae   :  { %v437_v55 = vpop.permute.xlu0 %436 }
 0x2af   :  { %v439_v56 = vpop.permute.xlu1 %438  ;;  %v465_v57 = vsel %vm452_vm3, %v437_v55, 0.0 }
 0x2b0   :  { %466 = vadd.xlane.f32.xlu1 %v465_v57  ;;  %v468_v58 = vsel %vm452_vm3, %v439_v56, 0.0 }
 0x2b1   :  { %469 = vadd.xlane.f32.xlu0 %v468_v58 }
 0x2b2   :  { %v441_v59 = vpop.permute.xlu0 %440 }
 0x2b3   :  { %v443_v60 = vpop.permute.xlu1 %442  ;;  %v471_v61 = vsel %vm452_vm3, %v441_v59, 0.0 }
 0x2b4   :  { %472 = vadd.xlane.f32.xlu1 %v471_v61  ;;  %v474_v62 = vsel %vm452_vm3, %v443_v60, 0.0 }
 0x2b5   :  { %475 = vadd.xlane.f32.xlu0 %v474_v62 }
 0x330   :  { %v461_v63 = vpop.xlane.xlu0 %460 }
 0x331   :  { %v489_v0 = vrot.slane %v461_v63, 4 }
 0x333   :  { %v490_v1 = vadd.f32 %v489_v0, %v461_v63 }
 0x334   :  { %v455_v2 = vpop.xlane.xlu0 %454 }
 0x335   :  { %v491_v3 = vrot.slane %v490_v1, 2  ;;  %v477_v4 = vrot.slane %v455_v2, 4 }
 0x337   :  { %v492_v5 = vadd.f32 %v491_v3, %v490_v1  ;;  %v478_v6 = vadd.f32 %v477_v4, %v455_v2 }
 0x338   :  { %v464_v7 = vpop.xlane.xlu0 %463  ;;  %v458_v8 = vpop.xlane.xlu1 %457 }
 0x339   :  { %v493_v9 = vrot.slane %v492_v5, 1  ;;  %v479_v10 = vrot.slane %v478_v6, 2  ;;  %v495_v11 = vrot.slane %v464_v7, 4  ;;  %v483_v12 = vrot.slane %v458_v8, 4 }
 0x33b   :  { %v494_v13 = vadd.f32 %v493_v9, %v492_v5  ;;  %v480_v14 = vadd.f32 %v479_v10, %v478_v6  ;;  %v496_v15 = vadd.f32 %v495_v11, %v464_v7  ;;  %v484_v16 = vadd.f32 %v483_v12, %v458_v8 }
 0x33d   :  { %v527_v17 = vmul.f32 0.020833334, %v494_v13  ;;  %v481_v18 = vrot.slane %v480_v14, 1  ;;  %v497_v19 = vrot.slane %v496_v15, 2  ;;  %v485_v20 = vrot.slane %v484_v16, 2  ;;  %v467_v21 = vpop.xlane.xlu1 %466 }
 0x33e   :  { %v501_v22 = vrot.slane %v467_v21, 4  ;;  %v470_v23 = vpop.xlane.xlu0 %469 }
 0x33f   :  { %v482_v25 = vadd.f32 %v481_v18, %v480_v14  ;;  %v498_v26 = vadd.f32 %v497_v19, %v496_v15  ;;  %v486_v27 = vadd.f32 %v485_v20, %v484_v16  ;;  %v507_v28 = vrot.slane %v470_v23, 4 }
 0x340   :  { %v502_v32 = vadd.f32 %v501_v22, %v467_v21  ;;  %v1072_v30 = vsub.f32 %v1026_v24, %v527_v17 }
 0x341   :  { %v525_v33 = vmul.f32 0.020833334, %v482_v25  ;;  %v499_v35 = vrot.slane %v498_v26, 1  ;;  %v487_v36 = vrot.slane %v486_v27, 1  ;;  %v508_v37 = vadd.f32 %v507_v28, %v470_v23  ;;  %v473_v38 = vpop.xlane.xlu1 %472 }
 0x342   :  { %v503_v41 = vrot.slane %v502_v32, 2  ;;  %v513_v42 = vrot.slane %v473_v38, 4  ;;  %v476_v43 = vpop.xlane.xlu0 %475  ;;  %v543_v44 = vmul.f32 %v1072_v30, %v1072_v30 }
 0x343   :  { %v500_v47 = vadd.f32 %v499_v35, %v498_v26  ;;  %v488_v48 = vadd.f32 %v487_v36, %v486_v27  ;;  %v509_v49 = vrot.slane %v508_v37, 2  ;;  %v519_v50 = vrot.slane %v476_v43, 4  ;;  %v685_v36 = vld [vmem:[%s1188_s5] sm:$0xff] }
 0x344   :  { %v504_v51 = vadd.f32 %v503_v41, %v502_v32  ;;  %v514_v52 = vadd.f32 %v513_v42, %v473_v38  ;;  %561 = vrot.lane.b32.xlu1 %v543_v44, %s877_s1  ;;  %v1078_v24 = vsub.f32 %v1032_v29, %v525_v33 }
 0x345   :  { %v528_v53 = vmul.f32 0.020833334, %v500_v47  ;;  %v526_v54 = vmul.f32 0.020833334, %v488_v48  ;;  %v510_v55 = vadd.f32 %v509_v49, %v508_v37  ;;  %v520_v56 = vadd.f32 %v519_v50, %v476_v43  ;;  %v698_v37 = vld [vmem:[%s1189_s6] sm:$0xff] }
 0x346   :  { %v505_v57 = vrot.slane %v504_v51, 1  ;;  %v515_v58 = vrot.slane %v514_v52, 2  ;;  %v541_v59 = vmul.f32 %v1078_v24, %v1078_v24 }
 0x347   :  { %v511_v60 = vrot.slane %v510_v55, 1  ;;  %v521_v61 = vrot.slane %v520_v56, 2  ;;  %v1083_v62 = vsub.f32 %v1034_v31, %v528_v53  ;;  %v1086_v63 = vsub.f32 %v1041_v34, %v526_v54 }
 0x348   :  { %v506_v0 = vadd.f32 %v505_v57, %v504_v51  ;;  %v516_v29 = vadd.f32 %v515_v58, %v514_v52  ;;  %557 = vrot.lane.b32.xlu1 %v541_v59, %s877_s1 }
 0x349   :  { %v512_v1 = vadd.f32 %v511_v60, %v510_v55  ;;  %v522_v2 = vadd.f32 %v521_v61, %v520_v56  ;;  %v544_v3 = vmul.f32 %v1083_v62, %v1083_v62  ;;  %v542_v4 = vmul.f32 %v1086_v63, %v1086_v63 }
 0x34a   :  { %v529_v5 = vmul.f32 0.020833334, %v506_v0  ;;  %v517_v6 = vrot.slane %v516_v29, 1 }
 0x34b   :  { %v530_v7 = vmul.f32 0.020833334, %v512_v1  ;;  %v523_v31 = vrot.slane %v522_v2, 1  ;;  %559 = vrot.lane.b32.xlu0 %v542_v4, %s877_s1 }
 0x34c   :  { %v518_v34 = vadd.f32 %v517_v6, %v516_v29  ;;  %563 = vrot.lane.b32.xlu1 %v544_v3, %s877_s1  ;;  %v1096_v8 = vsub.f32 %v1045_v39, %v529_v5 }
 0x34d   :  { %v524_v9 = vadd.f32 %v523_v31, %v522_v2  ;;  %v1099_v10 = vsub.f32 %v1047_v40, %v530_v7 }
 0x34e   :  { %v531_v11 = vmul.f32 0.020833334, %v518_v34  ;;  %v545_v12 = vmul.f32 %v1096_v8, %v1096_v8 }
 0x34f   :  { %v532_v13 = vmul.f32 0.020833334, %v524_v9  ;;  %v546_v14 = vmul.f32 %v1099_v10, %v1099_v10 }
 0x350   :  { %565 = vrot.lane.b32.xlu0 %v545_v12, %s877_s1  ;;  %v1107_v15 = vsub.f32 %v1055_v45, %v531_v11 }
 0x351   :  { %567 = vrot.lane.b32.xlu1 %v546_v14, %s877_s1  ;;  %v1111_v39 = vsub.f32 %v1057_v46, %v532_v13 }
 0x352   :  { %v547_v40 = vmul.f32 %v1107_v15, %v1107_v15 }
 0x353   :  { %v548_v16 = vmul.f32 %v1111_v39, %v1111_v39 }
 0x354   :  { %569 = vrot.lane.b32.xlu0 %v547_v40, %s877_s1 }
 0x355   :  { %571 = vrot.lane.b32.xlu1 %v548_v16, %s877_s1 }
 0x3b6   :  { %v562_v17 = vpop.permute.xlu1 %561 }
 0x3b7   :  { %v587_v18 = vsel %vm452_vm3, %v562_v17, 0.0 }
 0x3b8   :  { %588 = vadd.xlane.f32.xlu0 %v587_v18 }
 0x3ba   :  { %v558_v45 = vpop.permute.xlu1 %557 }
 0x3bb   :  { %v581_v19 = vsel %vm452_vm3, %v558_v45, 0.0 }
 0x3bc   :  { %582 = vadd.xlane.f32.xlu0 %v581_v19 }
 0x3bd   :  { %v560_v46 = vpop.permute.xlu0 %559 }
 0x3be   :  { %v564_v20 = vpop.permute.xlu1 %563  ;;  %v584_v21 = vsel %vm452_vm3, %v560_v46, 0.0 }
 0x3bf   :  { %585 = vadd.xlane.f32.xlu1 %v584_v21  ;;  %v590_v22 = vsel %vm452_vm3, %v564_v20, 0.0 }
 0x3c0   :  { %591 = vadd.xlane.f32.xlu0 %v590_v22 }
 0x3c2   :  { %v566_v23 = vpop.permute.xlu0 %565 }
 0x3c3   :  { %v568_v25 = vpop.permute.xlu1 %567  ;;  %v593_v26 = vsel %vm452_vm3, %v566_v23, 0.0 }
 0x3c4   :  { %594 = vadd.xlane.f32.xlu1 %v593_v26  ;;  %v596_v27 = vsel %vm452_vm3, %v568_v25, 0.0 }
 0x3c5   :  { %597 = vadd.xlane.f32.xlu0 %v596_v27 }
 0x3c6   :  { %v570_v28 = vpop.permute.xlu0 %569 }
 0x3c7   :  { %v572_v32 = vpop.permute.xlu1 %571  ;;  %v599_v33 = vsel %vm452_vm3, %v570_v28, 0.0 }
 0x3c8   :  { %600 = vadd.xlane.f32.xlu1 %v599_v33  ;;  %v602_v35 = vsel %vm452_vm3, %v572_v32, 0.0 }
 0x3c9   :  { %603 = vadd.xlane.f32.xlu0 %v602_v35 }
 0x3d9   :  { %687 = vrot.lane.b32.xlu1 %v685_v36, %s876_s0 }
 0x3df   :  { %700 = vrot.lane.b32.xlu0 %v698_v37, %s876_s0 }
 0x445   :  { %v589_v38 = vpop.xlane.xlu0 %588 }
 0x446   :  { %v617_v41 = vrot.slane %v589_v38, 4 }
 0x448   :  { %v618_v42 = vadd.f32 %v617_v41, %v589_v38 }
 0x449   :  { %v583_v43 = vpop.xlane.xlu0 %582 }
 0x44a   :  { %v619_v44 = vrot.slane %v618_v42, 2  ;;  %v605_v47 = vrot.slane %v583_v43, 4 }
 0x44c   :  { %v620_v48 = vadd.f32 %v619_v44, %v618_v42  ;;  %v606_v49 = vadd.f32 %v605_v47, %v583_v43  ;;  %v586_v50 = vpop.xlane.xlu1 %585 }
 0x44d   :  { %v592_v51 = vpop.xlane.xlu0 %591  ;;  %v611_v52 = vrot.slane %v586_v50, 4 }
 0x44e   :  { %v621_v53 = vrot.slane %v620_v48, 1  ;;  %v607_v54 = vrot.slane %v606_v49, 2  ;;  %v623_v55 = vrot.slane %v592_v51, 4 }
 0x44f   :  { %v612_v56 = vadd.f32 %v611_v52, %v586_v50 }
 0x450   :  { %v622_v57 = vadd.f32 %v621_v53, %v620_v48  ;;  %v608_v58 = vadd.f32 %v607_v54, %v606_v49  ;;  %v624_v59 = vadd.f32 %v623_v55, %v592_v51 }
 0x451   :  { %v613_v60 = vrot.slane %v612_v56, 2  ;;  %v595_v61 = vpop.xlane.xlu1 %594 }
 0x452   :  { %v655_v0 = vmul.f32 0.020833334, %v622_v57  ;;  %v609_v29 = vrot.slane %v608_v58, 1  ;;  %v625_v1 = vrot.slane %v624_v59, 2  ;;  %v629_v2 = vrot.slane %v595_v61, 4  ;;  %v598_v3 = vpop.xlane.xlu0 %597 }
 0x453   :  { %v614_v4 = vadd.f32 %v613_v60, %v612_v56  ;;  %v635_v5 = vrot.slane %v598_v3, 4 }
 0x454   :  { %v663_v6 = vadd.f32 1e-05, %v655_v0  ;;  %v610_v7 = vadd.f32 %v609_v29, %v608_v58  ;;  %v626_v31 = vadd.f32 %v625_v1, %v624_v59  ;;  %v630_v34 = vadd.f32 %v629_v2, %v595_v61 }
 0x455   :  { %v615_v9 = vrot.slane %v614_v4, 1  ;;  %v636_v11 = vadd.f32 %v635_v5, %v598_v3  ;;  %v601_v12 = vpop.xlane.xlu1 %600 }
 0x456   :  { %860 = vrsqrt.f32 %v663_v6  ;;  %v653_v13 = vmul.f32 0.020833334, %v610_v7  ;;  %v627_v14 = vrot.slane %v626_v31, 1  ;;  %v631_v40 = vrot.slane %v630_v34, 2  ;;  %v604_v16 = vpop.xlane.xlu0 %603 }
 0x457   :  { %v616_v17 = vadd.f32 %v615_v9, %v614_v4  ;;  %v637_v18 = vrot.slane %v636_v11, 2  ;;  %v641_v45 = vrot.slane %v601_v12, 4  ;;  %v647_v19 = vrot.slane %v604_v16, 4 }
 0x458   :  { %v661_v46 = vadd.f32 1e-05, %v653_v13  ;;  %v628_v20 = vadd.f32 %v627_v14, %v626_v31  ;;  %v632_v21 = vadd.f32 %v631_v40, %v630_v34 }
 0x459   :  { %v654_v22 = vmul.f32 0.020833334, %v616_v17  ;;  %v638_v23 = vadd.f32 %v637_v18, %v636_v11  ;;  %v642_v25 = vadd.f32 %v641_v45, %v601_v12  ;;  %v648_v26 = vadd.f32 %v647_v19, %v604_v16  ;;  %v688_v52 = vpop.permute.xlu1 %687 }
 0x45a   :  { %862 = vrsqrt.f32 %v661_v46  ;;  %v656_v27 = vmul.f32 0.020833334, %v628_v20  ;;  %v633_v28 = vrot.slane %v632_v21, 1  ;;  %v701_v57 = vpop.permute.xlu0 %700 }
 0x45b   :  { %v662_v32 = vadd.f32 1e-05, %v654_v22  ;;  %v639_v33 = vrot.slane %v638_v23, 1  ;;  %v643_v35 = vrot.slane %v642_v25, 2  ;;  %v649_v36 = vrot.slane %v648_v26, 2 }
 0x45c   :  { %v664_v37 = vadd.f32 1e-05, %v656_v27  ;;  %v634_v38 = vadd.f32 %v633_v28, %v632_v21 }
 0x45d   :  { %864 = vrsqrt.f32 %v662_v32  ;;  %v640_v41 = vadd.f32 %v639_v33, %v638_v23  ;;  %v644_v42 = vadd.f32 %v643_v35, %v642_v25  ;;  %v650_v43 = vadd.f32 %v649_v36, %v648_v26 }
 0x45e   :  { %866 = vrsqrt.f32 %v664_v37  ;;  %v657_v44 = vmul.f32 0.020833334, %v634_v38 }
 0x45f   :  { %v658_v47 = vmul.f32 0.020833334, %v640_v41  ;;  %v645_v48 = vrot.slane %v644_v42, 1  ;;  %v651_v49 = vrot.slane %v650_v43, 1 }
 0x460   :  { %v861_v50 = vpop.eup %860  ;;  %v665_v51 = vadd.f32 1e-05, %v657_v44 }
 0x461   :  { %v666_v53 = vadd.f32 1e-05, %v658_v47  ;;  %v646_v54 = vadd.f32 %v645_v48, %v644_v42  ;;  %v652_v55 = vadd.f32 %v651_v49, %v650_v43  ;;  %v679_v56 = vmul.f32 %v861_v50, %v1072_v30 }
 0x462   :  { %868 = vrsqrt.f32 %v665_v51 }
 0x463   :  { %870 = vrsqrt.f32 %v666_v53  ;;  %v659_v58 = vmul.f32 0.020833334, %v646_v54  ;;  %v660_v59 = vmul.f32 0.020833334, %v652_v55  ;;  %v692_v60 = vmul.f32 %v688_v52, %v679_v56 }
 0x464   :  { %v863_v61 = vpop.eup %862 }
 0x465   :  { %v667_v0 = vadd.f32 1e-05, %v659_v58  ;;  %v668_v29 = vadd.f32 1e-05, %v660_v59  ;;  %v705_v1 = vadd.f32 %v701_v57, %v692_v60  ;;  %v677_v2 = vmul.f32 %v863_v61, %v1078_v24 }
 0x467   :  { %v865_v3 = vpop.eup %864  ;;  %872 = vrsqrt.f32 %v667_v0  ;;  %v812_v4 = vpack.c.bf16 %v705_v1, %v705_v1  ;;  %v690_v5 = vmul.f32 %v688_v52, %v677_v2 }
 0x468   :  { %v867_v6 = vpop.eup %866  ;;  %874 = vrsqrt.f32 %v668_v29  ;;  %v678_v30 = vmul.f32 %v865_v3, %v1086_v63 }
 0x469   :  { %747 = vrot.lane.b32.xlu0 %v812_v4, %s877_s1  ;;  %v703_v7 = vadd.f32 %v701_v57, %v690_v5  ;;  %v680_v31 = vmul.f32 %v867_v6, %v1083_v62 }
 0x46a   :  { %v691_v11 = vmul.f32 %v688_v52, %v678_v30 }
 0x46b   :  { %v810_v34 = vpack.c.bf16 %v703_v7, %v703_v7  ;;  %v693_v9 = vmul.f32 %v688_v52, %v680_v31 }
 0x46c   :  { %v869_v12 = vpop.eup %868  ;;  %v704_v17 = vadd.f32 %v701_v57, %v691_v11 }
 0x46d   :  { %v871_v13 = vpop.eup %870  ;;  %743 = vrot.lane.b32.xlu1 %v810_v34, %s877_s1  ;;  %v706_v24 = vadd.f32 %v701_v57, %v693_v9  ;;  %v681_v14 = vmul.f32 %v869_v12, %v1096_v8 }
 0x46e   :  { %v682_v40 = vmul.f32 %v871_v13, %v1099_v10  ;;  %v811_v20 = vpack.c.bf16 %v704_v17, %v704_v17 }
 0x46f   :  { %v813_v16 = vpack.c.bf16 %v706_v24, %v706_v24  ;;  %v694_v63 = vmul.f32 %v688_v52, %v681_v14 }
 0x470   :  { %v695_v18 = vmul.f32 %v688_v52, %v682_v40 }
 0x471   :  { %v873_v45 = vpop.eup %872  ;;  %749 = vrot.lane.b32.xlu1 %v813_v16, %s877_s1  ;;  %v707_v62 = vadd.f32 %v701_v57, %v694_v63 }
 0x472   :  { %v875_v19 = vpop.eup %874  ;;  %v683_v46 = vmul.f32 %v873_v45, %v1107_v15  ;;  %v708_v22 = vadd.f32 %v701_v57, %v695_v18 }
 0x473   :  { %v814_v21 = vpack.c.bf16 %v707_v62, %v707_v62  ;;  %v684_v23 = vmul.f32 %v875_v19, %v1111_v39 }
 0x474   :  { %v696_v25 = vmul.f32 %v688_v52, %v683_v46  ;;  %v815_v26 = vpack.c.bf16 %v708_v22, %v708_v22 }
 0x475   :  { %745 = vrot.lane.b32.xlu1 %v811_v20, %s877_s1  ;;  %751 = vrot.lane.b32.xlu0 %v814_v21, %s877_s1  ;;  %v697_v8 = vmul.f32 %v688_v52, %v684_v23 }
 0x476   :  { %v709_v10 = vadd.f32 %v701_v57, %v696_v25 }
 0x477   :  { %v710_v27 = vadd.f32 %v701_v57, %v697_v8 }
 0x478   :  { %v816_v28 = vpack.c.bf16 %v709_v10, %v709_v10 }
 0x479   :  { %753 = vrot.lane.b32.xlu1 %v815_v26, %s877_s1  ;;  %v817_v15 = vpack.c.bf16 %v710_v27, %v710_v27 }
 0x47a   :  { %755 = vrot.lane.b32.xlu0 %v816_v28, %s877_s1 }
 0x47d   :  { %757 = vrot.lane.b32.xlu1 %v817_v15, %s877_s1 }
 0x4db   :  { %v748_v32 = vpop.permute.xlu0 %747 }
 0x4dc   :  { %770 = vst.msk [vmem:[%s1190_s7 + $0x8] sm:$0xf] %vm767_vm4, %v748_v32 }
 0x4df   :  { %v744_v39 = vpop.permute.xlu1 %743 }
 0x4e0   :  { %768 = vst.msk [vmem:[%s1190_s7] sm:$0xf] %vm767_vm4, %v744_v39 }
 0x4e3   :  { %v750_v33 = vpop.permute.xlu1 %749 }
 0x4e4   :  { %771 = vst.msk [vmem:[%s1190_s7 + $0xc] sm:$0xf] %vm767_vm4, %v750_v33 }
 0x4e7   :  { %v746_v35 = vpop.permute.xlu1 %745  ;;  %v752_v36 = vpop.permute.xlu0 %751 }
 0x4e8   :  { %769 = vst.msk [vmem:[%s1190_s7 + $0x4] sm:$0xf] %vm767_vm4, %v746_v35  ;;  %772 = vst.msk [vmem:[%s1190_s7 + $0x10] sm:$0xf] %vm767_vm4, %v752_v36 }
 0x4eb   :  { %v754_v37 = vpop.permute.xlu1 %753 }
 0x4ec   :  { %773 = vst.msk [vmem:[%s1190_s7 + $0x14] sm:$0xf] %vm767_vm4, %v754_v37  ;;  %v756_v38 = vpop.permute.xlu0 %755 }
 0x4ed   :  { %774 = vst.msk [vmem:[%s1190_s7 + $0x18] sm:$0xf] %vm767_vm4, %v756_v38 }
 0x4ef   :  { %v758_v41 = vpop.permute.xlu1 %757 }
 0x4f0   :  { %775 = vst.msk [vmem:[%s1190_s7 + $0x1c] sm:$0xf] %vm767_vm4, %v758_v41 }

</bundles_post_ra>
